<compile_context>
chip_gen: v5e
topology: v5e:2x2
jax: 0.10.0
libtpu: 0.0.40
codegen_flags: <defaults>
</compile_context>

<pallas_src>
import functools
import math

import jax
import jax.numpy as jnp
from jax import lax
from jax.experimental import pallas as pl
from jax.experimental.pallas import tpu as pltpu

MiB = 1024 * 1024


# ----------------------------------------------------------------------------
# Hardware-aware sizing helpers
# ----------------------------------------------------------------------------
@functools.lru_cache(maxsize=1)
def _vmem_limit_bytes():
    """Generation-aware scoped-VMEM limit: ~96 MiB on 128-MiB parts (v5e/v6e),
    ~44 MiB on 64-MiB parts (v7x)."""
    phys = None
    try:
        info = pltpu.get_tpu_info()
        phys = getattr(info, "vmem_capacity_bytes", None)
    except Exception:
        phys = None
    if not phys:
        try:
            kind = jax.devices()[0].device_kind.lower()
            phys = 64 * MiB if "v7" in kind else 128 * MiB
        except Exception:
            phys = 64 * MiB
    return 96 * MiB if phys >= 100 * MiB else 44 * MiB


def _pick_tile(dim, candidates):
    """Largest candidate tile that evenly divides `dim`, else the full dim (always legal)."""
    for c in candidates:
        if dim >= c and dim % c == 0:
            return c
    return dim


def _pick_matmul_tiles(M, N, K, vmem_limit):
    big = vmem_limit >= 80 * MiB        # v5e/v6e: allow 1024-wide M/N tiles
    mn_cands = (1024, 512, 256, 128) if big else (512, 256, 128)
    return (_pick_tile(M, mn_cands), _pick_tile(N, mn_cands),
            _pick_tile(K, (512, 256, 128)))


def _pick_head_block(num_heads, head_dim):
    """Smallest head-group size whose lane width (hb*head_dim) is a multiple of 128."""
    for hb in range(1, num_heads + 1):
        if num_heads % hb == 0 and (hb * head_dim) % 128 == 0:
            return hb
    # Fallback: only the full hidden width is a legal lane block.  The q-tile picker
    # below shrinks tq so the (NH, tq, S) weights block stays inside the VMEM budget.
    return num_heads


def _pick_q_tile(S, HBD, HB, in_isz, out_isz, w_isz, mask_isz, budget):
    """Largest q-tile whose per-step VMEM footprint (double-buffered) fits the budget."""
    kv_bytes = 2 * 2 * S * HBD * in_isz                  # K + V blocks, double-buffered

    def step_bytes(tq):
        return (kv_bytes
                + 2 * tq * HBD * (in_isz + out_isz)       # Q in, O out
                + 2 * HB * tq * S * w_isz                 # attn-weights out
                + 2 * tq * S * mask_isz                   # additive mask
                + 4 * tq * S * 4)                         # in-kernel f32 temporaries

    cands = [c for c in (1024, 512, 256, 128, 64, 32, 16, 8) if c <= S and S % c == 0]
    if not cands:
        cands = [S]
    for tq in cands:
        if step_bytes(tq) <= budget:
            return tq
    return cands[-1]


# ----------------------------------------------------------------------------
# Kernel 1: tiled matmul + bias (shared by all projection variants)
# ----------------------------------------------------------------------------
def matmul_bias_kernel(x_ref, w_ref, b_ref, o_ref, acc_ref, *, k_axis, compute_dtype):
    k = pl.program_id(k_axis)

    @pl.when(k == 0)
    def _init():
        acc_ref[...] = jnp.zeros_like(acc_ref)

    x = x_ref[...]
    w = w_ref[...]
    if x.dtype != compute_dtype:          # no-op when inputs are pre-cast in the wrapper
        x = x.astype(compute_dtype)
    if w.dtype != compute_dtype:
        w = w.astype(compute_dtype)
    acc_ref[...] += jnp.dot(x, w, preferred_element_type=jnp.float32)

    @pl.when(k == pl.num_programs(k_axis) - 1)
    def _finalize():
        o_ref[...] = (acc_ref[...] + b_ref[...].astype(jnp.float32)).astype(o_ref.dtype)


def _matmul_compiler_params(n_parallel):
    return pltpu.CompilerParams(
        dimension_semantics=("parallel",) * n_parallel + ("arbitrary",),
        vmem_limit_bytes=_vmem_limit_bytes(),
    )


def stacked_qkv_projection(x3, w3, b3, *, out_dtype, compute_dtype):
    """General path (distinct q/k/v inputs).  x3: (3,M,K), w3: (3,K,H), b3: (3,1,H)
    -> (3, M, H)."""
    compute_dtype = jnp.dtype(compute_dtype)
    P, M, K = x3.shape
    H = w3.shape[-1]
    tm, tn, tk = _pick_matmul_tiles(M, H, K, _vmem_limit_bytes())
    grid = (P, M // tm, H // tn, K // tk)
    kern = functools.partial(matmul_bias_kernel, k_axis=3, compute_dtype=compute_dtype)
    bytes_accessed = int(x3.size * x3.dtype.itemsize + w3.size * w3.dtype.itemsize
                         + b3.size * b3.dtype.itemsize
                         + P * M * H * jnp.dtype(out_dtype).itemsize)
    return pl.pallas_call(
        kern,
        out_shape=jax.ShapeDtypeStruct((P, M, H), out_dtype),
        grid=grid,
        in_specs=[
            pl.BlockSpec((None, tm, tk), lambda p, i, j, k: (p, i, k)),
            pl.BlockSpec((None, tk, tn), lambda p, i, j, k: (p, k, j)),
            pl.BlockSpec((None, 1, tn), lambda p, i, j, k: (p, 0, j)),
        ],
        out_specs=pl.BlockSpec((None, tm, tn), lambda p, i, j, k: (p, i, j)),
        scratch_shapes=[pltpu.VMEM((tm, tn), jnp.float32)],
        compiler_params=_matmul_compiler_params(3),
        cost_estimate=pl.CostEstimate(flops=2 * P * M * H * K, transcendentals=0,
                                      bytes_accessed=bytes_accessed),
    )(x3, w3, b3)


def fused_qkv_projection(x, w_qkv, b_qkv, *, out_dtype, compute_dtype):
    """Self-attention fast path: one matmul (M,K)@(K,3H) writing directly into the
    (3, M, H) layout the attention kernel consumes.  Requires H % 128 == 0 so each
    column block is lane-dense and never straddles the q/k/v boundary."""
    compute_dtype = jnp.dtype(compute_dtype)
    M, K = x.shape
    N3 = w_qkv.shape[-1]
    H = N3 // 3
    tm, tn, tk = _pick_matmul_tiles(M, H, K, _vmem_limit_bytes())
    nb = H // tn                                  # column blocks per projection
    grid = (M // tm, N3 // tn, K // tk)
    kern = functools.partial(matmul_bias_kernel, k_axis=2, compute_dtype=compute_dtype)
    bytes_accessed = int(x.size * x.dtype.itemsize + w_qkv.size * w_qkv.dtype.itemsize
                         + b_qkv.size * b_qkv.dtype.itemsize
                         + 3 * M * H * jnp.dtype(out_dtype).itemsize)
    return pl.pallas_call(
        kern,
        out_shape=jax.ShapeDtypeStruct((3, M, H), out_dtype),
        grid=grid,
        in_specs=[
            pl.BlockSpec((tm, tk), lambda i, j, k: (i, k)),
            pl.BlockSpec((tk, tn), lambda i, j, k: (k, j)),
            pl.BlockSpec((1, tn), lambda i, j, k: (0, j)),
        ],
        out_specs=pl.BlockSpec((None, tm, tn), lambda i, j, k: (j // nb, i, j % nb)),
        scratch_shapes=[pltpu.VMEM((tm, tn), jnp.float32)],
        compiler_params=_matmul_compiler_params(2),
        cost_estimate=pl.CostEstimate(flops=2 * M * N3 * K, transcendentals=0,
                                      bytes_accessed=bytes_accessed),
    )(x, w_qkv, b_qkv)


def linear(x, w, b, *, out_dtype, compute_dtype):
    """Output projection: (M,K)@(K,N)+b."""
    compute_dtype = jnp.dtype(compute_dtype)
    M, K = x.shape
    N = w.shape[-1]
    tm, tn, tk = _pick_matmul_tiles(M, N, K, _vmem_limit_bytes())
    grid = (M // tm, N // tn, K // tk)
    kern = functools.partial(matmul_bias_kernel, k_axis=2, compute_dtype=compute_dtype)
    bytes_accessed = int(x.size * x.dtype.itemsize + w.size * w.dtype.itemsize
                         + b.size * b.dtype.itemsize
                         + M * N * jnp.dtype(out_dtype).itemsize)
    return pl.pallas_call(
        kern,
        out_shape=jax.ShapeDtypeStruct((M, N), out_dtype),
        grid=grid,
        in_specs=[
            pl.BlockSpec((tm, tk), lambda i, j, k: (i, k)),
            pl.BlockSpec((tk, tn), lambda i, j, k: (k, j)),
            pl.BlockSpec((1, tn), lambda i, j, k: (0, j)),
        ],
        out_specs=pl.BlockSpec((tm, tn), lambda i, j, k: (i, j)),
        scratch_shapes=[pltpu.VMEM((tm, tn), jnp.float32)],
        compiler_params=_matmul_compiler_params(2),
        cost_estimate=pl.CostEstimate(flops=2 * M * N * K, transcendentals=0,
                                      bytes_accessed=bytes_accessed),
    )(x, w, b)


# ----------------------------------------------------------------------------
# Kernel 2: scaled-dot-product attention, grid = (batch, q-tile, head-block)
# ----------------------------------------------------------------------------
def attention_kernel(*refs, heads_per_block, head_dim, compute_dtype, has_mask):
    if has_mask:
        q_ref, k_ref, v_ref, m_ref, o_ref, w_ref = refs
    else:
        q_ref, k_ref, v_ref, o_ref, w_ref = refs
        m_ref = None

    def to_compute(x):
        return x if x.dtype == compute_dtype else x.astype(compute_dtype)

    # q already carries the 1/sqrt(head_dim) scale (folded into wq in prepare_params).
    q_all = to_compute(q_ref[...])          # (tq, HB*HD)
    k_all = to_compute(k_ref[...])          # (S,  HB*HD)
    v_all = to_compute(v_ref[...])          # (S,  HB*HD)
    mask = m_ref[...].astype(jnp.float32) if has_mask else None

    ctxs = []
    for h in range(heads_per_block):
        sl = slice(h * head_dim, (h + 1) * head_dim)
        qh, kh, vh = q_all[:, sl], k_all[:, sl], v_all[:, sl]

        # q @ k^T without materializing the transpose: contract last axes of both.
        scores = lax.dot_general(
            qh, kh, dimension_numbers=(((1,), (1,)), ((), ())),
            preferred_element_type=jnp.float32)           # (tq, S) f32
        if has_mask:
            scores = scores + mask

        # Numerically stable softmax, f32 statistics; exact reciprocal on a (tq,1)
        # vector is essentially free and keeps the returned weights summing to 1.
        scores = scores - jnp.max(scores, axis=-1, keepdims=True)
        e = jnp.exp(scores)
        p = e * pl.reciprocal(jnp.sum(e, axis=-1, keepdims=True))

        w_ref[h] = p.astype(w_ref.dtype)                  # lane-dense (tq, S) store
        ctxs.append(jnp.dot(p.astype(compute_dtype), vh,
                            preferred_element_type=jnp.float32))  # (tq, HD)

    # Single lane-dense store of the whole (tq, HB*HD) context block.
    ctx = ctxs[0] if len(ctxs) == 1 else jnp.concatenate(ctxs, axis=-1)
    o_ref[...] = ctx.astype(o_ref.dtype)


def multihead_attention(qkv, mask, num_heads, head_dim, *, compute_dtype, weights_dtype):
    """qkv: (3, B, S, H) fused projections; mask: (B, 1, S, S) additive or None.
    Returns (attn_out (B,S,H) in compute_dtype -- already head-merged --,
             attn_weights (B, NH, S, S) in weights_dtype)."""
    compute_dtype = jnp.dtype(compute_dtype)
    weights_dtype = jnp.dtype(weights_dtype)
    _, B, S, H = qkv.shape
    NH = num_heads
    assert NH * head_dim == H, "num_heads * head_dim must equal hidden_size"

    HB = _pick_head_block(NH, head_dim)
    NHB = NH // HB
    HBD = HB * head_dim

    vmem_limit = _vmem_limit_bytes()
    in_isz = jnp.dtype(qkv.dtype).itemsize
    out_isz = compute_dtype.itemsize
    w_isz = weights_dtype.itemsize
    mask_isz = 4 if mask is not None else 0
    tq = _pick_q_tile(S, HBD, HB, in_isz, out_isz, w_isz, mask_isz,
                      budget=int(vmem_limit * 0.8))

    # Head axis innermost: Q and mask blocks are unchanged across heads (no re-DMA).
    grid = (B, S // tq, NHB)

    kern = functools.partial(
        attention_kernel, heads_per_block=HB, head_dim=head_dim,
        compute_dtype=compute_dtype, has_mask=mask is not None)

    in_specs = [
        pl.BlockSpec((None, None, tq, HBD), lambda b, qi, h: (0, b, qi, h)),   # Q
        pl.BlockSpec((None, None, S, HBD), lambda b, qi, h: (1, b, 0, h)),     # K
        pl.BlockSpec((None, None, S, HBD), lambda b, qi, h: (2, b, 0, h)),     # V
    ]
    args = [qkv, qkv, qkv]
    if mask is not None:
        in_specs.append(pl.BlockSpec((None, None, tq, S), lambda b, qi, h: (b, 0, qi, 0)))
        args.append(mask)

    out_specs = (
        pl.BlockSpec((None, tq, HBD), lambda b, qi, h: (b, qi, h)),
        pl.BlockSpec((None, HB, tq, S), lambda b, qi, h: (b, h, qi, 0)),
    )

    flops = 4 * B * NH * S * S * head_dim          # QK^T + PV
    transcendentals = B * NH * S * S               # exp
    bytes_accessed = int(qkv.size * in_isz
                         + (B * S * S * mask_isz)
                         + B * S * H * out_isz
                         + B * NH * S * S * w_isz)

    return pl.pallas_call(
        kern,
        out_shape=(jax.ShapeDtypeStruct((B, S, H), compute_dtype),
                   jax.ShapeDtypeStruct((B, NH, S, S), weights_dtype)),
        grid=grid,
        in_specs=in_specs,
        out_specs=out_specs,
        compiler_params=pltpu.CompilerParams(
            # No cross-iteration accumulation anywhere -> all axes parallel (megacore).
            dimension_semantics=("parallel", "parallel", "parallel"),
            vmem_limit_bytes=vmem_limit),
        cost_estimate=pl.CostEstimate(flops=flops, transcendentals=transcendentals,
                                      bytes_accessed=bytes_accessed),
    )(*args)


# ----------------------------------------------------------------------------
# Parameter preparation (one-time) + full forward pass
# ----------------------------------------------------------------------------
def prepare_params(params, head_dim, *, compute_dtype=jnp.bfloat16):
    """One-time weight prep (call ONCE, not per forward):
       * folds 1/sqrt(head_dim) into wq/bq,
       * pre-casts weights to the MXU compute dtype (biases stay f32 -- negligible),
       * pre-stacks / pre-concatenates the QKV weights.
    Note: both the stacked and concatenated forms are kept for demo purposes; in
    production keep only the one matching your call pattern."""
    scale = 1.0 / math.sqrt(float(head_dim))
    wdt = jnp.dtype(compute_dtype)
    wq = (params["wq"].astype(jnp.float32) * scale).astype(wdt)
    wk = params["wk"].astype(wdt)
    wv = params["wv"].astype(wdt)
    bq = params["bq"].astype(jnp.float32) * scale
    bk = params["bk"].astype(jnp.float32)
    bv = params["bv"].astype(jnp.float32)
    return {
        "w_qkv_stacked": jnp.stack([wq, wk, wv], axis=0),              # (3, H, H)
        "b_qkv_stacked": jnp.stack([bq, bk, bv], axis=0)[:, None, :],  # (3, 1, H)
        "w_qkv_cat": jnp.concatenate([wq, wk, wv], axis=1),            # (H, 3H)
        "b_qkv_cat": jnp.concatenate([bq, bk, bv], axis=0)[None, :],   # (1, 3H)
        "wo": params["wo"].astype(wdt),                                # (H, H)
        "bo": params["bo"].astype(jnp.float32)[None, :],               # (1, H)
    }


def attention_forward(prep, query, key, value, attention_mask=None, *,
                      num_heads, head_dim, compute_dtype=jnp.bfloat16,
                      weights_dtype=None):
    """Pallas forward of phi.adapters.Attention.  `key`/`value` may be None (or the same
    array as `query`) for the fused self-attention projection path.
    Returns (attn_output f32 (B,S,H), attn_weights (B,NH,S,S) in weights_dtype)."""
    compute_dtype = jnp.dtype(compute_dtype)
    weights_dtype = compute_dtype if weights_dtype is None else jnp.dtype(weights_dtype)
    B, S, H = query.shape

    self_attn = (key is None or key is query) and (value is None or value is query)
    key = query if key is None else key
    value = query if value is None else value
    # Fused single-matmul path needs lane-dense (multiple-of-128) weight column blocks.
    use_fused = self_attn and (H % 128 == 0)

    q_in = query.astype(compute_dtype)
    if use_fused:
        qkv = fused_qkv_projection(
            q_in.reshape(B * S, H), prep["w_qkv_cat"], prep["b_qkv_cat"],
            out_dtype=compute_dtype, compute_dtype=compute_dtype)
    else:
        x3 = jnp.stack(
            [q_in, key.astype(compute_dtype), value.astype(compute_dtype)],
            axis=0).reshape(3, B * S, H)
        qkv = stacked_qkv_projection(
            x3, prep["w_qkv_stacked"], prep["b_qkv_stacked"],
            out_dtype=compute_dtype, compute_dtype=compute_dtype)
    qkv = qkv.reshape(3, B, S, H)

    mask = None
    if attention_mask is not None:
        # TODO(synk): per-head masks (B, NH, S, S) would need a head-indexed BlockSpec.
        mask = jnp.broadcast_to(attention_mask.astype(jnp.float32), (B, 1, S, S))

    attn_out, attn_weights = multihead_attention(
        qkv, mask, num_heads, head_dim,
        compute_dtype=compute_dtype, weights_dtype=weights_dtype)

    # TODO(synk): attn_dropout (nn.Dropout) is identity in eval mode.
    out = linear(attn_out.reshape(B * S, H), prep["wo"], prep["bo"],
                 out_dtype=jnp.float32, compute_dtype=compute_dtype)
    return out.reshape(B, S, H), attn_weights


# ----------------------------------------------------------------------------
# Pure-JAX reference (correctness check)
# ----------------------------------------------------------------------------
def _split_heads(x, num_heads, head_dim):
    B, S, H = x.shape
    return x.reshape(B, S, num_heads, head_dim).transpose(0, 2, 1, 3)


def attention_reference(params, query, key, value, attention_mask, num_heads, head_dim):
    def proj(x, w, b):
        return x @ w + b

    q = _split_heads(proj(query, params["wq"], params["bq"]), num_heads, head_dim)
    k = _split_heads(proj(key, params["wk"], params["bk"]), num_heads, head_dim)
    v = _split_heads(proj(value, params["wv"], params["bv"]), num_heads, head_dim)
    scores = jnp.einsum("bhqd,bhkd->bhqk", q, k) / math.sqrt(float(head_dim))
    if attention_mask is not None:
        scores = scores + attention_mask
    w = jax.nn.softmax(scores, axis=-1)
    o = jnp.einsum("bhqk,bhkd->bhqd", w, v)
    o = o.transpose(0, 2, 1, 3).reshape(query.shape[0], query.shape[1], -1)
    return o @ params["wo"] + params["bo"], w


def _make_params(key0, H):
    keys = jax.random.split(key0, 8)
    scale = 1.0 / math.sqrt(H)
    return {
        "wq": jax.random.normal(keys[0], (H, H), jnp.float32) * scale,
        "bq": jax.random.normal(keys[1], (H,), jnp.float32) * 0.02,
        "wk": jax.random.normal(keys[2], (H, H), jnp.float32) * scale,
        "bk": jax.random.normal(keys[3], (H,), jnp.float32) * 0.02,
        "wv": jax.random.normal(keys[4], (H, H), jnp.float32) * scale,
        "bv": jax.random.normal(keys[5], (H,), jnp.float32) * 0.02,
        "wo": jax.random.normal(keys[6], (H, H), jnp.float32) * scale,
        "bo": jax.random.normal(keys[7], (H,), jnp.float32) * 0.02,
    }


if __name__ == "__main__":
    # ---- main config: hidden_size=32, num_attention_heads=4 (stacked q/k/v path) ----
    B, S, H, NH = 2, 8, 32, 4
    HD = H // NH

    root = jax.random.PRNGKey(0)
    kp, kq, kk, kv, kp2, kq2 = jax.random.split(root, 6)
    params = _make_params(kp, H)
    query = jax.random.normal(kq, (B, S, H), jnp.float32)
    key_in = jax.random.normal(kk, (B, S, H), jnp.float32)
    value = jax.random.normal(kv, (B, S, H), jnp.float32)
    causal = jnp.where(jnp.tril(jnp.ones((S, S), jnp.bool_)), 0.0, -1e9).astype(jnp.float32)
    attention_mask = jnp.broadcast_to(causal, (B, 1, S, S))

    ref_out, ref_w = attention_reference(params, query, key_in, value, attention_mask, NH, HD)

    # --- f32 compute path: tight check --------------------------------------
    prep_f32 = prepare_params(params, HD, compute_dtype=jnp.float32)
    fwd_f32 = jax.jit(functools.partial(
        attention_forward, num_heads=NH, head_dim=HD, compute_dtype=jnp.float32))
    out, attn_w = fwd_f32(prep_f32, query, key_in, value, attention_mask)
    out = jax.block_until_ready(out)
    attn_w = jax.block_until_ready(attn_w)
    assert out.shape == (B, S, H) and attn_w.shape == (B, NH, S, S)
    assert jnp.allclose(out, ref_out, atol=5e-3, rtol=5e-3)
    assert jnp.allclose(attn_w, ref_w, atol=5e-3, rtol=5e-3)

    # --- bf16 production path: loose sanity check ----------------------------
    prep_bf16 = prepare_params(params, HD, compute_dtype=jnp.bfloat16)
    fwd_bf16 = jax.jit(functools.partial(
        attention_forward, num_heads=NH, head_dim=HD, compute_dtype=jnp.bfloat16))
    out_bf, attn_w_bf = fwd_bf16(prep_bf16, query, key_in, value, attention_mask)
    out_bf = jax.block_until_ready(out_bf)
    attn_w_bf = jax.block_until_ready(attn_w_bf)
    assert out_bf.shape == (B, S, H) and attn_w_bf.shape == (B, NH, S, S)
    assert out_bf.dtype == jnp.float32 and attn_w_bf.dtype == jnp.bfloat16
    assert jnp.allclose(out_bf.astype(jnp.float32), ref_out, atol=0.15, rtol=0.1)
    assert jnp.allclose(attn_w_bf.astype(jnp.float32), ref_w, atol=0.03, rtol=0.05)

    # ---- self-attention config with H=128 (fused single-matmul QKV path) ----
    H2, NH2 = 128, 4
    HD2 = H2 // NH2
    params2 = _make_params(kp2, H2)
    query2 = jax.random.normal(kq2, (B, S, H2), jnp.float32)
    mask2 = jnp.broadcast_to(causal, (B, 1, S, S))
    ref_out2, ref_w2 = attention_reference(params2, query2, query2, query2, mask2, NH2, HD2)

    prep2 = prepare_params(params2, HD2, compute_dtype=jnp.float32)
    fwd2 = jax.jit(functools.partial(
        attention_forward, num_heads=NH2, head_dim=HD2, compute_dtype=jnp.float32))
    out2, attn_w2 = fwd2(prep2, query2, None, None, mask2)   # key/value=None -> fused path
    out2 = jax.block_until_ready(out2)
    attn_w2 = jax.block_until_ready(attn_w2)
    assert out2.shape == (B, S, H2) and attn_w2.shape == (B, NH2, S, S)
    assert jnp.allclose(out2, ref_out2, atol=5e-3, rtol=5e-3)
    assert jnp.allclose(attn_w2, ref_w2, atol=5e-3, rtol=5e-3)

    print("KERNEL_OK")
</pallas_src>

<mosaic_0001>
module attributes {stable_mosaic.version = 11 : i64} {
  func.func @matmul_bias_kernel(%arg0: i32, %arg1: i32, %arg2: i32, %arg3: i32, %arg4: memref<1x16x32xf32, #tpu.memory_space<vmem>>, %arg5: memref<1x32x32xf32, #tpu.memory_space<vmem>>, %arg6: memref<1x1x32xf32, #tpu.memory_space<vmem>>, %arg7: memref<1x16x32xf32, #tpu.memory_space<vmem>>, %arg8: memref<16x32xf32, #tpu.memory_space<vmem>>) attributes {dimension_semantics = [#tpu.dimension_semantics<parallel>, #tpu.dimension_semantics<parallel>, #tpu.dimension_semantics<parallel>, #tpu.dimension_semantics<arbitrary>], iteration_bounds = array<i64: 3, 1, 1, 1>, scalar_prefetch = 0 : i64, scratch_operands = 1 : i64, tpu.core_type = #tpu.core_type<tc>, window_params = [{transform_indices = @transform_0, window_bounds = array<i64: 1, 16, 32>}, {transform_indices = @transform_1, window_bounds = array<i64: 1, 32, 32>}, {transform_indices = @transform_2, window_bounds = array<i64: 1, 1, 32>}, {transform_indices = @transform_3, window_bounds = array<i64: 1, 16, 32>}]} {
    %c0_i32 = arith.constant 0 : i32
    %0 = arith.cmpi eq, %arg3, %c0_i32 : i32
    %1 = arith.extui %0 : i1 to i32
    %c0_i32_0 = arith.constant 0 : i32
    %2 = arith.cmpi ne, %1, %c0_i32_0 : i32
    scf.if %2 {
      %cst_12 = arith.constant 0.000000e+00 : f32
      %14 = vector.broadcast %cst_12 : f32 to vector<16x32xf32>
      %c0_13 = arith.constant 0 : index
      %c0_14 = arith.constant 0 : index
      %15 = vector.load %arg8[%c0_13, %c0_14] : memref<16x32xf32, #tpu.memory_space<vmem>>, vector<16x32xf32>
      tpu.vector_store %arg8[%c0_13, %c0_14], %14 {strides = array<i32>} : memref<16x32xf32, #tpu.memory_space<vmem>>, vector<16x32xf32>,
    } else {
    }
    %c0 = arith.constant 0 : index
    %c0_1 = arith.constant 0 : index
    %c0_2 = arith.constant 0 : index
    %3 = vector.load %arg4[%c0, %c0_1, %c0_2] : memref<1x16x32xf32, #tpu.memory_space<vmem>>, vector<1x16x32xf32>
    %4 = vector.shape_cast %3 : vector<1x16x32xf32> to vector<16x32xf32>
    %c0_3 = arith.constant 0 : index
    %c0_4 = arith.constant 0 : index
    %c0_5 = arith.constant 0 : index
    %5 = vector.load %arg5[%c0_3, %c0_4, %c0_5] : memref<1x32x32xf32, #tpu.memory_space<vmem>>, vector<1x32x32xf32>
    %6 = vector.shape_cast %5 : vector<1x32x32xf32> to vector<32x32xf32>
    %c0_6 = arith.constant 0 : index
    %c0_7 = arith.constant 0 : index
    %7 = vector.load %arg8[%c0_6, %c0_7] : memref<16x32xf32, #tpu.memory_space<vmem>>, vector<16x32xf32>
    %cst = arith.constant dense<0.000000e+00> : vector<16x32xf32>
    %8 = tpu.matmul %4, %6, %cst {dimension_numbers = #tpu.dot_dimension_numbers<[1], [0], [0], [1], [0, 0, 1, 1], [], []>} : vector<16x32xf32>, vector<32x32xf32>, vector<16x32xf32> -> vector<16x32xf32>
    %9 = arith.addf %7, %8 : vector<16x32xf32>
    %c0_8 = arith.constant 0 : index
    %c0_9 = arith.constant 0 : index
    %10 = vector.load %arg8[%c0_8, %c0_9] : memref<16x32xf32, #tpu.memory_space<vmem>>, vector<16x32xf32>
    tpu.vector_store %arg8[%c0_8, %c0_9], %9 {strides = array<i32>} : memref<16x32xf32, #tpu.memory_space<vmem>>, vector<16x32xf32>,
    %c0_i32_10 = arith.constant 0 : i32
    %11 = arith.cmpi eq, %arg3, %c0_i32_10 : i32
    %12 = arith.extui %11 : i1 to i32
    %c0_i32_11 = arith.constant 0 : i32
    %13 = arith.cmpi ne, %12, %c0_i32_11 : i32
    scf.if %13 {
      %c0_12 = arith.constant 0 : index
      %c0_13 = arith.constant 0 : index
      %14 = vector.load %arg8[%c0_12, %c0_13] : memref<16x32xf32, #tpu.memory_space<vmem>>, vector<16x32xf32>
      %c0_14 = arith.constant 0 : index
      %c0_15 = arith.constant 0 : index
      %c0_16 = arith.constant 0 : index
      %15 = vector.load %arg6[%c0_14, %c0_15, %c0_16] : memref<1x1x32xf32, #tpu.memory_space<vmem>>, vector<1x1x32xf32>
      %16 = vector.shape_cast %15 : vector<1x1x32xf32> to vector<1x32xf32>
      %17 = vector.broadcast %16 : vector<1x32xf32> to vector<16x32xf32>
      %18 = arith.addf %14, %17 : vector<16x32xf32>
      %c0_17 = arith.constant 0 : index
      %c0_18 = arith.constant 0 : index
      %c0_19 = arith.constant 0 : index
      %19 = vector.load %arg7[%c0_17, %c0_18, %c0_19] : memref<1x16x32xf32, #tpu.memory_space<vmem>>, vector<1x16x32xf32>
      %20 = vector.shape_cast %19 : vector<1x16x32xf32> to vector<16x32xf32>
      %21 = vector.shape_cast %18 : vector<16x32xf32> to vector<1x16x32xf32>
      tpu.vector_store %arg7[%c0_17, %c0_18, %c0_19], %21 {strides = array<i32>} : memref<1x16x32xf32, #tpu.memory_space<vmem>>, vector<1x16x32xf32>,
    } else {
    }
    return
  }
  func.func @transform_0(%arg0: i32, %arg1: i32, %arg2: i32, %arg3: i32) -> (i32, i32, i32) {
    %c0_i32 = arith.constant 0 : i32
    return %arg0, %arg1, %arg3 : i32, i32, i32
  }
  func.func @transform_1(%arg0: i32, %arg1: i32, %arg2: i32, %arg3: i32) -> (i32, i32, i32) {
    %c0_i32 = arith.constant 0 : i32
    return %arg0, %arg3, %arg2 : i32, i32, i32
  }
  func.func @transform_2(%arg0: i32, %arg1: i32, %arg2: i32, %arg3: i32) -> (i32, i32, i32) {
    %c0_i32 = arith.constant 0 : i32
    %c0_i32_0 = arith.constant 0 : i32
    return %arg0, %c0_i32, %arg2 : i32, i32, i32
  }
  func.func @transform_3(%arg0: i32, %arg1: i32, %arg2: i32, %arg3: i32) -> (i32, i32, i32) {
    %c0_i32 = arith.constant 0 : i32
    return %arg0, %arg1, %arg2 : i32, i32, i32
  }
}

module attributes {stable_mosaic.version = 11 : i64} {
  func.func @matmul_bias_kernel(%arg0: i32, %arg1: i32, %arg2: i32, %arg3: memref<16x32xf32, #tpu.memory_space<vmem>>, %arg4: memref<32x32xf32, #tpu.memory_space<vmem>>, %arg5: memref<1x32xf32, #tpu.memory_space<vmem>>, %arg6: memref<16x32xf32, #tpu.memory_space<vmem>>, %arg7: memref<16x32xf32, #tpu.memory_space<vmem>>) attributes {dimension_semantics = [#tpu.dimension_semantics<parallel>, #tpu.dimension_semantics<parallel>, #tpu.dimension_semantics<arbitrary>], iteration_bounds = array<i64: 1, 1, 1>, scalar_prefetch = 0 : i64, scratch_operands = 1 : i64, tpu.core_type = #tpu.core_type<tc>, window_params = [{transform_indices = @transform_0, window_bounds = array<i64: 16, 32>}, {transform_indices = @transform_1, window_bounds = array<i64: 32, 32>}, {transform_indices = @transform_2, window_bounds = array<i64: 1, 32>}, {transform_indices = @transform_3, window_bounds = array<i64: 16, 32>}]} {
    %c0_i32 = arith.constant 0 : i32
    %0 = arith.cmpi eq, %arg2, %c0_i32 : i32
    %1 = arith.extui %0 : i1 to i32
    %c0_i32_0 = arith.constant 0 : i32
    %2 = arith.cmpi ne, %1, %c0_i32_0 : i32
    scf.if %2 {
      %cst_10 = arith.constant 0.000000e+00 : f32
      %12 = vector.broadcast %cst_10 : f32 to vector<16x32xf32>
      %c0_11 = arith.constant 0 : index
      %c0_12 = arith.constant 0 : index
      %13 = vector.load %arg7[%c0_11, %c0_12] : memref<16x32xf32, #tpu.memory_space<vmem>>, vector<16x32xf32>
      tpu.vector_store %arg7[%c0_11, %c0_12], %12 {strides = array<i32>} : memref<16x32xf32, #tpu.memory_space<vmem>>, vector<16x32xf32>,
    } else {
    }
    %c0 = arith.constant 0 : index
    %c0_1 = arith.constant 0 : index
    %3 = vector.load %arg3[%c0, %c0_1] : memref<16x32xf32, #tpu.memory_space<vmem>>, vector<16x32xf32>
    %c0_2 = arith.constant 0 : index
    %c0_3 = arith.constant 0 : index
    %4 = vector.load %arg4[%c0_2, %c0_3] : memref<32x32xf32, #tpu.memory_space<vmem>>, vector<32x32xf32>
    %c0_4 = arith.constant 0 : index
    %c0_5 = arith.constant 0 : index
    %5 = vector.load %arg7[%c0_4, %c0_5] : memref<16x32xf32, #tpu.memory_space<vmem>>, vector<16x32xf32>
    %cst = arith.constant dense<0.000000e+00> : vector<16x32xf32>
    %6 = tpu.matmul %3, %4, %cst {dimension_numbers = #tpu.dot_dimension_numbers<[1], [0], [0], [1], [0, 0, 1, 1], [], []>} : vector<16x32xf32>, vector<32x32xf32>, vector<16x32xf32> -> vector<16x32xf32>
    %7 = arith.addf %5, %6 : vector<16x32xf32>
    %c0_6 = arith.constant 0 : index
    %c0_7 = arith.constant 0 : index
    %8 = vector.load %arg7[%c0_6, %c0_7] : memref<16x32xf32, #tpu.memory_space<vmem>>, vector<16x32xf32>
    tpu.vector_store %arg7[%c0_6, %c0_7], %7 {strides = array<i32>} : memref<16x32xf32, #tpu.memory_space<vmem>>, vector<16x32xf32>,
    %c0_i32_8 = arith.constant 0 : i32
    %9 = arith.cmpi eq, %arg2, %c0_i32_8 : i32
    %10 = arith.extui %9 : i1 to i32
    %c0_i32_9 = arith.constant 0 : i32
    %11 = arith.cmpi ne, %10, %c0_i32_9 : i32
    scf.if %11 {
      %c0_10 = arith.constant 0 : index
      %c0_11 = arith.constant 0 : index
      %12 = vector.load %arg7[%c0_10, %c0_11] : memref<16x32xf32, #tpu.memory_space<vmem>>, vector<16x32xf32>
      %c0_12 = arith.constant 0 : index
      %c0_13 = arith.constant 0 : index
      %13 = vector.load %arg5[%c0_12, %c0_13] : memref<1x32xf32, #tpu.memory_space<vmem>>, vector<1x32xf32>
      %14 = vector.broadcast %13 : vector<1x32xf32> to vector<16x32xf32>
      %15 = arith.addf %12, %14 : vector<16x32xf32>
      %c0_14 = arith.constant 0 : index
      %c0_15 = arith.constant 0 : index
      %16 = vector.load %arg6[%c0_14, %c0_15] : memref<16x32xf32, #tpu.memory_space<vmem>>, vector<16x32xf32>
      tpu.vector_store %arg6[%c0_14, %c0_15], %15 {strides = array<i32>} : memref<16x32xf32, #tpu.memory_space<vmem>>, vector<16x32xf32>,
    } else {
    }
    return
  }
  func.func @transform_0(%arg0: i32, %arg1: i32, %arg2: i32) -> (i32, i32) {
    %c0_i32 = arith.constant 0 : i32
    return %arg0, %arg2 : i32, i32
  }
  func.func @transform_1(%arg0: i32, %arg1: i32, %arg2: i32) -> (i32, i32) {
    %c0_i32 = arith.constant 0 : i32
    return %arg2, %arg1 : i32, i32
  }
  func.func @transform_2(%arg0: i32, %arg1: i32, %arg2: i32) -> (i32, i32) {
    %c0_i32 = arith.constant 0 : i32
    %c0_i32_0 = arith.constant 0 : i32
    return %c0_i32, %arg1 : i32, i32
  }
  func.func @transform_3(%arg0: i32, %arg1: i32, %arg2: i32) -> (i32, i32) {
    %c0_i32 = arith.constant 0 : i32
    return %arg0, %arg1 : i32, i32
  }
}

module attributes {stable_mosaic.version = 11 : i64} {
  func.func @attention_kernel(%arg0: i32, %arg1: i32, %arg2: i32, %arg3: memref<1x1x8x32xf32, #tpu.memory_space<vmem>>, %arg4: memref<1x1x8x32xf32, #tpu.memory_space<vmem>>, %arg5: memref<1x1x8x32xf32, #tpu.memory_space<vmem>>, %arg6: memref<1x1x8x8xf32, #tpu.memory_space<vmem>>, %arg7: memref<1x8x32xf32, #tpu.memory_space<vmem>>, %arg8: memref<1x4x8x8xf32, #tpu.memory_space<vmem>>) attributes {dimension_semantics = [#tpu.dimension_semantics<parallel>, #tpu.dimension_semantics<parallel>, #tpu.dimension_semantics<parallel>], iteration_bounds = array<i64: 2, 1, 1>, scalar_prefetch = 0 : i64, scratch_operands = 0 : i64, tpu.core_type = #tpu.core_type<tc>, window_params = [{transform_indices = @transform_0, window_bounds = array<i64: 1, 1, 8, 32>}, {transform_indices = @transform_1, window_bounds = array<i64: 1, 1, 8, 32>}, {transform_indices = @transform_2, window_bounds = array<i64: 1, 1, 8, 32>}, {transform_indices = @transform_3, window_bounds = array<i64: 1, 1, 8, 8>}, {transform_indices = @transform_4, window_bounds = array<i64: 1, 8, 32>}, {transform_indices = @transform_5, window_bounds = array<i64: 1, 4, 8, 8>}]} {
    %c0 = arith.constant 0 : index
    %c0_0 = arith.constant 0 : index
    %c0_1 = arith.constant 0 : index
    %c0_2 = arith.constant 0 : index
    %0 = vector.load %arg3[%c0, %c0_0, %c0_1, %c0_2] : memref<1x1x8x32xf32, #tpu.memory_space<vmem>>, vector<1x1x8x32xf32>
    %1 = vector.shape_cast %0 : vector<1x1x8x32xf32> to vector<8x32xf32>
    %c0_3 = arith.constant 0 : index
    %c0_4 = arith.constant 0 : index
    %c0_5 = arith.constant 0 : index
    %c0_6 = arith.constant 0 : index
    %2 = vector.load %arg4[%c0_3, %c0_4, %c0_5, %c0_6] : memref<1x1x8x32xf32, #tpu.memory_space<vmem>>, vector<1x1x8x32xf32>
    %3 = vector.shape_cast %2 : vector<1x1x8x32xf32> to vector<8x32xf32>
    %c0_7 = arith.constant 0 : index
    %c0_8 = arith.constant 0 : index
    %c0_9 = arith.constant 0 : index
    %c0_10 = arith.constant 0 : index
    %4 = vector.load %arg5[%c0_7, %c0_8, %c0_9, %c0_10] : memref<1x1x8x32xf32, #tpu.memory_space<vmem>>, vector<1x1x8x32xf32>
    %5 = vector.shape_cast %4 : vector<1x1x8x32xf32> to vector<8x32xf32>
    %c0_11 = arith.constant 0 : index
    %c0_12 = arith.constant 0 : index
    %c0_13 = arith.constant 0 : index
    %c0_14 = arith.constant 0 : index
    %6 = vector.load %arg6[%c0_11, %c0_12, %c0_13, %c0_14] : memref<1x1x8x8xf32, #tpu.memory_space<vmem>>, vector<1x1x8x8xf32>
    %7 = vector.shape_cast %6 : vector<1x1x8x8xf32> to vector<8x8xf32>
    %8 = vector.extract_strided_slice %1 {offsets = [0, 0], sizes = [8, 8], strides = [1, 1]} : vector<8x32xf32> to vector<8x8xf32>
    %9 = vector.extract_strided_slice %3 {offsets = [0, 0], sizes = [8, 8], strides = [1, 1]} : vector<8x32xf32> to vector<8x8xf32>
    %10 = vector.extract_strided_slice %5 {offsets = [0, 0], sizes = [8, 8], strides = [1, 1]} : vector<8x32xf32> to vector<8x8xf32>
    %cst = arith.constant dense<0.000000e+00> : vector<8x8xf32>
    %11 = tpu.matmul %8, %9, %cst {dimension_numbers = #tpu.dot_dimension_numbers<[1], [1], [0], [0], [0, 0, 1, 0], [], []>} : vector<8x8xf32>, vector<8x8xf32>, vector<8x8xf32> -> vector<8x8xf32>
    %12 = arith.addf %11, %7 : vector<8x8xf32>
    %cst_15 = arith.constant dense<0xFF800000> : vector<8xf32>
    %13 = vector.multi_reduction <maximumf>, %12, %cst_15 [1] : vector<8x8xf32> to vector<8xf32>
    %14 = vector.shape_cast %13 : vector<8xf32> to vector<8x1xf32>
    %15 = vector.broadcast %14 : vector<8x1xf32> to vector<8x8xf32>
    %16 = arith.subf %12, %15 : vector<8x8xf32>
    %17 = math.exp %16 : vector<8x8xf32>
    %cst_16 = arith.constant dense<0.000000e+00> : vector<8xf32>
    %18 = vector.multi_reduction <add>, %17, %cst_16 [1] : vector<8x8xf32> to vector<8xf32>
    %19 = vector.shape_cast %18 : vector<8xf32> to vector<8x1xf32>
    %20 = tpu.reciprocal %19 : vector<8x1xf32> -> vector<8x1xf32>
    %21 = vector.broadcast %20 : vector<8x1xf32> to vector<8x8xf32>
    %22 = arith.mulf %17, %21 : vector<8x8xf32>
    %c0_17 = arith.constant 0 : index
    %c0_18 = arith.constant 0 : index
    %c0_19 = arith.constant 0 : index
    %c0_20 = arith.constant 0 : index
    %23 = vector.load %arg8[%c0_17, %c0_18, %c0_19, %c0_20] : memref<1x4x8x8xf32, #tpu.memory_space<vmem>>, vector<1x1x8x8xf32>
    %24 = vector.shape_cast %23 : vector<1x1x8x8xf32> to vector<8x8xf32>
    %25 = vector.shape_cast %22 : vector<8x8xf32> to vector<1x1x8x8xf32>
    tpu.vector_store %arg8[%c0_17, %c0_18, %c0_19, %c0_20], %25 {strides = array<i32>} : memref<1x4x8x8xf32, #tpu.memory_space<vmem>>, vector<1x1x8x8xf32>,
    %cst_21 = arith.constant dense<0.000000e+00> : vector<8x8xf32>
    %26 = tpu.matmul %22, %10, %cst_21 {dimension_numbers = #tpu.dot_dimension_numbers<[1], [0], [0], [1], [0, 0, 1, 1], [], []>} : vector<8x8xf32>, vector<8x8xf32>, vector<8x8xf32> -> vector<8x8xf32>
    %27 = vector.extract_strided_slice %1 {offsets = [0, 8], sizes = [8, 8], strides = [1, 1]} : vector<8x32xf32> to vector<8x8xf32>
    %28 = vector.extract_strided_slice %3 {offsets = [0, 8], sizes = [8, 8], strides = [1, 1]} : vector<8x32xf32> to vector<8x8xf32>
    %29 = vector.extract_strided_slice %5 {offsets = [0, 8], sizes = [8, 8], strides = [1, 1]} : vector<8x32xf32> to vector<8x8xf32>
    %cst_22 = arith.constant dense<0.000000e+00> : vector<8x8xf32>
    %30 = tpu.matmul %27, %28, %cst_22 {dimension_numbers = #tpu.dot_dimension_numbers<[1], [1], [0], [0], [0, 0, 1, 0], [], []>} : vector<8x8xf32>, vector<8x8xf32>, vector<8x8xf32> -> vector<8x8xf32>
    %31 = arith.addf %30, %7 : vector<8x8xf32>
    %cst_23 = arith.constant dense<0xFF800000> : vector<8xf32>
    %32 = vector.multi_reduction <maximumf>, %31, %cst_23 [1] : vector<8x8xf32> to vector<8xf32>
    %33 = vector.shape_cast %32 : vector<8xf32> to vector<8x1xf32>
    %34 = vector.broadcast %33 : vector<8x1xf32> to vector<8x8xf32>
    %35 = arith.subf %31, %34 : vector<8x8xf32>
    %36 = math.exp %35 : vector<8x8xf32>
    %cst_24 = arith.constant dense<0.000000e+00> : vector<8xf32>
    %37 = vector.multi_reduction <add>, %36, %cst_24 [1] : vector<8x8xf32> to vector<8xf32>
    %38 = vector.shape_cast %37 : vector<8xf32> to vector<8x1xf32>
    %39 = tpu.reciprocal %38 : vector<8x1xf32> -> vector<8x1xf32>
    %40 = vector.broadcast %39 : vector<8x1xf32> to vector<8x8xf32>
    %41 = arith.mulf %36, %40 : vector<8x8xf32>
    %c0_25 = arith.constant 0 : index
    %c1 = arith.constant 1 : index
    %c0_26 = arith.constant 0 : index
    %c0_27 = arith.constant 0 : index
    %42 = vector.load %arg8[%c0_25, %c1, %c0_26, %c0_27] : memref<1x4x8x8xf32, #tpu.memory_space<vmem>>, vector<1x1x8x8xf32>
    %43 = vector.shape_cast %42 : vector<1x1x8x8xf32> to vector<8x8xf32>
    %44 = vector.shape_cast %41 : vector<8x8xf32> to vector<1x1x8x8xf32>
    tpu.vector_store %arg8[%c0_25, %c1, %c0_26, %c0_27], %44 {strides = array<i32>} : memref<1x4x8x8xf32, #tpu.memory_space<vmem>>, vector<1x1x8x8xf32>,
    %cst_28 = arith.constant dense<0.000000e+00> : vector<8x8xf32>
    %45 = tpu.matmul %41, %29, %cst_28 {dimension_numbers = #tpu.dot_dimension_numbers<[1], [0], [0], [1], [0, 0, 1, 1], [], []>} : vector<8x8xf32>, vector<8x8xf32>, vector<8x8xf32> -> vector<8x8xf32>
    %46 = vector.extract_strided_slice %1 {offsets = [0, 16], sizes = [8, 8], strides = [1, 1]} : vector<8x32xf32> to vector<8x8xf32>
    %47 = vector.extract_strided_slice %3 {offsets = [0, 16], sizes = [8, 8], strides = [1, 1]} : vector<8x32xf32> to vector<8x8xf32>
    %48 = vector.extract_strided_slice %5 {offsets = [0, 16], sizes = [8, 8], strides = [1, 1]} : vector<8x32xf32> to vector<8x8xf32>
    %cst_29 = arith.constant dense<0.000000e+00> : vector<8x8xf32>
    %49 = tpu.matmul %46, %47, %cst_29 {dimension_numbers = #tpu.dot_dimension_numbers<[1], [1], [0], [0], [0, 0, 1, 0], [], []>} : vector<8x8xf32>, vector<8x8xf32>, vector<8x8xf32> -> vector<8x8xf32>
    %50 = arith.addf %49, %7 : vector<8x8xf32>
    %cst_30 = arith.constant dense<0xFF800000> : vector<8xf32>
    %51 = vector.multi_reduction <maximumf>, %50, %cst_30 [1] : vector<8x8xf32> to vector<8xf32>
    %52 = vector.shape_cast %51 : vector<8xf32> to vector<8x1xf32>
    %53 = vector.broadcast %52 : vector<8x1xf32> to vector<8x8xf32>
    %54 = arith.subf %50, %53 : vector<8x8xf32>
    %55 = math.exp %54 : vector<8x8xf32>
    %cst_31 = arith.constant dense<0.000000e+00> : vector<8xf32>
    %56 = vector.multi_reduction <add>, %55, %cst_31 [1] : vector<8x8xf32> to vector<8xf32>
    %57 = vector.shape_cast %56 : vector<8xf32> to vector<8x1xf32>
    %58 = tpu.reciprocal %57 : vector<8x1xf32> -> vector<8x1xf32>
    %59 = vector.broadcast %58 : vector<8x1xf32> to vector<8x8xf32>
    %60 = arith.mulf %55, %59 : vector<8x8xf32>
    %c0_32 = arith.constant 0 : index
    %c2 = arith.constant 2 : index
    %c0_33 = arith.constant 0 : index
    %c0_34 = arith.constant 0 : index
    %61 = vector.load %arg8[%c0_32, %c2, %c0_33, %c0_34] : memref<1x4x8x8xf32, #tpu.memory_space<vmem>>, vector<1x1x8x8xf32>
    %62 = vector.shape_cast %61 : vector<1x1x8x8xf32> to vector<8x8xf32>
    %63 = vector.shape_cast %60 : vector<8x8xf32> to vector<1x1x8x8xf32>
    tpu.vector_store %arg8[%c0_32, %c2, %c0_33, %c0_34], %63 {strides = array<i32>} : memref<1x4x8x8xf32, #tpu.memory_space<vmem>>, vector<1x1x8x8xf32>,
    %cst_35 = arith.constant dense<0.000000e+00> : vector<8x8xf32>
    %64 = tpu.matmul %60, %48, %cst_35 {dimension_numbers = #tpu.dot_dimension_numbers<[1], [0], [0], [1], [0, 0, 1, 1], [], []>} : vector<8x8xf32>, vector<8x8xf32>, vector<8x8xf32> -> vector<8x8xf32>
    %65 = vector.extract_strided_slice %1 {offsets = [0, 24], sizes = [8, 8], strides = [1, 1]} : vector<8x32xf32> to vector<8x8xf32>
    %66 = vector.extract_strided_slice %3 {offsets = [0, 24], sizes = [8, 8], strides = [1, 1]} : vector<8x32xf32> to vector<8x8xf32>
    %67 = vector.extract_strided_slice %5 {offsets = [0, 24], sizes = [8, 8], strides = [1, 1]} : vector<8x32xf32> to vector<8x8xf32>
    %cst_36 = arith.constant dense<0.000000e+00> : vector<8x8xf32>
    %68 = tpu.matmul %65, %66, %cst_36 {dimension_numbers = #tpu.dot_dimension_numbers<[1], [1], [0], [0], [0, 0, 1, 0], [], []>} : vector<8x8xf32>, vector<8x8xf32>, vector<8x8xf32> -> vector<8x8xf32>
    %69 = arith.addf %68, %7 : vector<8x8xf32>
    %cst_37 = arith.constant dense<0xFF800000> : vector<8xf32>
    %70 = vector.multi_reduction <maximumf>, %69, %cst_37 [1] : vector<8x8xf32> to vector<8xf32>
    %71 = vector.shape_cast %70 : vector<8xf32> to vector<8x1xf32>
    %72 = vector.broadcast %71 : vector<8x1xf32> to vector<8x8xf32>
    %73 = arith.subf %69, %72 : vector<8x8xf32>
    %74 = math.exp %73 : vector<8x8xf32>
    %cst_38 = arith.constant dense<0.000000e+00> : vector<8xf32>
    %75 = vector.multi_reduction <add>, %74, %cst_38 [1] : vector<8x8xf32> to vector<8xf32>
    %76 = vector.shape_cast %75 : vector<8xf32> to vector<8x1xf32>
    %77 = tpu.reciprocal %76 : vector<8x1xf32> -> vector<8x1xf32>
    %78 = vector.broadcast %77 : vector<8x1xf32> to vector<8x8xf32>
    %79 = arith.mulf %74, %78 : vector<8x8xf32>
    %c0_39 = arith.constant 0 : index
    %c3 = arith.constant 3 : index
    %c0_40 = arith.constant 0 : index
    %c0_41 = arith.constant 0 : index
    %80 = vector.load %arg8[%c0_39, %c3, %c0_40, %c0_41] : memref<1x4x8x8xf32, #tpu.memory_space<vmem>>, vector<1x1x8x8xf32>
    %81 = vector.shape_cast %80 : vector<1x1x8x8xf32> to vector<8x8xf32>
    %82 = vector.shape_cast %79 : vector<8x8xf32> to vector<1x1x8x8xf32>
    tpu.vector_store %arg8[%c0_39, %c3, %c0_40, %c0_41], %82 {strides = array<i32>} : memref<1x4x8x8xf32, #tpu.memory_space<vmem>>, vector<1x1x8x8xf32>,
    %cst_42 = arith.constant dense<0.000000e+00> : vector<8x8xf32>
    %83 = tpu.matmul %79, %67, %cst_42 {dimension_numbers = #tpu.dot_dimension_numbers<[1], [0], [0], [1], [0, 0, 1, 1], [], []>} : vector<8x8xf32>, vector<8x8xf32>, vector<8x8xf32> -> vector<8x8xf32>
    %84 = tpu.concatenate %26, %45, %64, %83 in 1 : vector<8x8xf32>, vector<8x8xf32>, vector<8x8xf32>, vector<8x8xf32> -> vector<8x32xf32>
    %c0_43 = arith.constant 0 : index
    %c0_44 = arith.constant 0 : index
    %c0_45 = arith.constant 0 : index
    %85 = vector.load %arg7[%c0_43, %c0_44, %c0_45] : memref<1x8x32xf32, #tpu.memory_space<vmem>>, vector<1x8x32xf32>
    %86 = vector.shape_cast %85 : vector<1x8x32xf32> to vector<8x32xf32>
    %87 = vector.shape_cast %84 : vector<8x32xf32> to vector<1x8x32xf32>
    tpu.vector_store %arg7[%c0_43, %c0_44, %c0_45], %87 {strides = array<i32>} : memref<1x8x32xf32, #tpu.memory_space<vmem>>, vector<1x8x32xf32>,
    return
  }
  func.func @transform_0(%arg0: i32, %arg1: i32, %arg2: i32) -> (i32, i32, i32, i32) {
    %c0_i32 = arith.constant 0 : i32
    %c0_i32_0 = arith.constant 0 : i32
    return %c0_i32, %arg0, %arg1, %arg2 : i32, i32, i32, i32
  }
  func.func @transform_1(%arg0: i32, %arg1: i32, %arg2: i32) -> (i32, i32, i32, i32) {
    %c1_i32 = arith.constant 1 : i32
    %c0_i32 = arith.constant 0 : i32
    %c0_i32_0 = arith.constant 0 : i32
    return %c1_i32, %arg0, %c0_i32, %arg2 : i32, i32, i32, i32
  }
  func.func @transform_2(%arg0: i32, %arg1: i32, %arg2: i32) -> (i32, i32, i32, i32) {
    %c2_i32 = arith.constant 2 : i32
    %c0_i32 = arith.constant 0 : i32
    %c0_i32_0 = arith.constant 0 : i32
    return %c2_i32, %arg0, %c0_i32, %arg2 : i32, i32, i32, i32
  }
  func.func @transform_3(%arg0: i32, %arg1: i32, %arg2: i32) -> (i32, i32, i32, i32) {
    %c0_i32 = arith.constant 0 : i32
    %c0_i32_0 = arith.constant 0 : i32
    %c0_i32_1 = arith.constant 0 : i32
    return %arg0, %c0_i32, %arg1, %c0_i32_0 : i32, i32, i32, i32
  }
  func.func @transform_4(%arg0: i32, %arg1: i32, %arg2: i32) -> (i32, i32, i32) {
    %c0_i32 = arith.constant 0 : i32
    return %arg0, %arg1, %arg2 : i32, i32, i32
  }
  func.func @transform_5(%arg0: i32, %arg1: i32, %arg2: i32) -> (i32, i32, i32, i32) {
    %c0_i32 = arith.constant 0 : i32
    %c0_i32_0 = arith.constant 0 : i32
    return %arg0, %arg2, %arg1, %c0_i32 : i32, i32, i32, i32
  }
}

</mosaic_0001>

<bundles_post_ra>
// kernel: attention_forward.3
= control target key start
LH: loop header
LB: loop body
LE: loop exit
PB: predicated region body
PF: predicated region fallthrough
CT: control target
= control target key end

     0   :  { %s609_s12 = smov 0   ;;  %s611_s13 = smov 0   ;;  %s661_s0 = inlined_call_operand.vmem [shape: f32[3,16,32], index: 0, kind: input, shape index: {}]   ;;  %s662_s1 = inlined_call_operand.vmem [shape: f32[3,32,32], index: 1, kind: input, shape index: {}]   ;;  %s663_s2 = inlined_call_operand.vmem [shape: f32[3,1,32], index: 2, kind: input, shape index: {}]   ;;  %s664_s3 = inlined_call_operand.vmem [shape: f32[3,16,32], index: 3, kind: output, shape index: {}]  }
   0x1   :  { %s613_s14 = smov 0  }
   0x2 LB: > { %s39_s15 = sadd.s32 1, %s582_s13  ;;  %p520_p0 = scmp.ge.s32.totalorder %s586_s14, 1  ;;  %s586_s14 = sphi %s613_s14, %s13_s14   ;;  %s582_s13 = sphi %s611_s13, %s666_s13   ;;  %s578_s12 = sphi %s609_s12, %s665_s12  }
   0x3   : > { %p41_p1 = scmp.ge.s32.totalorder %s39_s15, 3  ;;  %p214_p2 = scmp.lt.s32.totalorder %s586_s14, 4 }
   0x5   : > { %s668_s15 = smov (%p41_p1, %s39_s15), 0  ;;  %p215_p3 = pnand %p520_p0, %p214_p2 }
   0x6   : > { %p271_p4 = scmp.lt.s32.totalorder (!%p215_p3), %s578_s12, 2 }
   0x7   : > { %218 = sbr.rel (%p215_p3) target bundleno = 163 (0xa3), region = 32 }
   0xc   : > { %vm319_vm0 = vcmask 261120   ;;  %v588_v0 = vmov 0.0   ;;  %s670_s12 = smov (!%p271_p4, %s578_s12), 2 }
   0xd   : > { %320 = vst.msk [vmem:[#allocation2] sm:$0xff] %vm319_vm0, %v588_v0  ;;  %s532_s16 = sshll.u32 %s670_s12, 5  ;;  %s301_s19 = scalar_lea.vmem %s663_s2, %s670_s12 }
   0xe   : > { %321 = vst.msk [vmem:[#allocation2 + $0x8] sm:$0xff] %vm319_vm0, %v588_v0  ;;  %s294_s22 = scalar_lea.vmem %s662_s1, %s532_s16  ;;  %s531_s23 = sshll.u32 %s670_s12, 4  ;;  %v563_v13 = vld [vmem:[%s301_s19] ss:$0 sm:$0xff] }
   0xf   : > { %v327_v1 = vld [vmem:[%s294_s22 + $0x18] sm:$0xff]  ;;  %v326_v2 = vld [vmem:[%s294_s22 + $0x10] sm:$0xff]  ;;  %v325_v3 = vld [vmem:[%s294_s22 + $0x8] sm:$0xff]  ;;  %s281_s26 = scalar_lea.vmem %s661_s0, %s531_s23  ;;  %s313_s29 = scalar_lea.vmem %s664_s3, %s531_s23 }
  0x10   : > { %349 = vmatpush.msra.mxu0 %v327_v1  ;;  %534 = vmatpush.msra.mxu1 %v327_v1  ;;  %v324_v4 = vld [vmem:[%s294_s22] sm:$0xff]  ;;  %v323_v6 = vld [vmem:[%s281_s26 + $0x8] sm:$0xff] }
  0x11   : > { %v322_v5 = vld [vmem:[%s281_s26] sm:$0xff] }
  0x12   : > { %350 = vmatpush.msra.mxu0 %v326_v2  ;;  %535 = vmatpush.msra.mxu1 %v326_v2 }
  0x14   : > { %351 = vmatpush.msra.mxu0 %v325_v3  ;;  %536 = vmatpush.msra.mxu1 %v325_v3  ;;  %v328_v7 = vld [vmem:[#allocation2] sm:$0xff] }
  0x15   : > { %v329_v8 = vld [vmem:[#allocation2 + $0x8] sm:$0xff] }
  0x16   : > { %352 = vmatpush.msra.mxu0 %v324_v4  ;;  %537 = vmatpush.msra.mxu1 %v324_v4 }
  0x17   : > { %527 = vmatmul.msk.f32.vlgmr.msra.gmra.mxu0 %vm319_vm0, %v322_v5  ;;  %528 = vmatmul.msk.f32.vlgmr.msra.gmra.mxu1 %vm319_vm0, %v323_v6 }
  0x94   : > { %v354_v9 = vpop.f32.mrf.mxu0  ;;  %v357_v10 = vpop.f32.mrf.mxu1 }
  0x95   : > { %v360_v11 = vadd.f32 %v354_v9, %v328_v7  ;;  %v361_v12 = vadd.f32 %v357_v10, %v329_v8 }
  0x97   : > { %362 = vst.msk [vmem:[#allocation2] sm:$0xff] %vm319_vm0, %v360_v11 }
  0x98   : > { %363 = vst.msk [vmem:[#allocation2 + $0x8] sm:$0xff] %vm319_vm0, %v361_v12 }
  0x9e   : > { %v367_v14 = vld [vmem:[#allocation2] sm:$0xff] }
  0x9f   : > { %v373_v15 = vadd.f32 %v563_v13, %v367_v14  ;;  %v368_v16 = vld [vmem:[#allocation2 + $0x8] sm:$0xff] }
  0xa0   : > { %v374_v17 = vadd.f32 %v563_v13, %v368_v16 }
  0xa1   : > { %375 = vst.msk [vmem:[%s313_s29] sm:$0xff] %vm319_vm0, %v373_v15 }
  0xa2   : > { %376 = vst.msk [vmem:[%s313_s29 + $0x8] sm:$0xff] %vm319_vm0, %v374_v17 }
  0xa3 PF: > { %s13_s14 = sadd.s32 1, %s586_s14   ;;  %s665_s12 = smov %s582_s13 }
  0xa4   : > { %p10_p5 = scmp.ge.s32.totalorder %s13_s14, 5   ;;  %s666_s13 = smov %s668_s15 }
  0xa6   :  { %12 = sbr.rel (!%p10_p5) target bundleno = 2 (0x2), region = 76 }

// kernel: attention_forward.5
= control target key start
LH: loop header
LB: loop body
LE: loop exit
PB: predicated region body
PF: predicated region fallthrough
CT: control target
= control target key end

     0   :  { %vm19_vm0 = vcmask 261120   ;;  %v132_v2 = vmov 0.0   ;;  %s188_s0 = inlined_call_operand.vmem [shape: f32[16,32], index: 0, kind: input, shape index: {}]   ;;  %s189_s1 = inlined_call_operand.vmem [shape: f32[32,32], index: 1, kind: input, shape index: {}]   ;;  %s190_s2 = inlined_call_operand.vmem [shape: f32[1,32], index: 2, kind: input, shape index: {}]   ;;  %s191_s3 = inlined_call_operand.hbm [shape: f32[16,32], index: 3, kind: output, shape index: {}]  }
   0x1   :  { %v27_v0 = vld [vmem:[%s189_s1 + $0x18] sm:$0xff]  ;;  %v26_v1 = vld [vmem:[%s189_s1 + $0x10] sm:$0xff]  ;;  %20 = vst.msk [vmem:[#allocation2] sm:$0xff] %vm19_vm0, %v132_v2  ;;  %v25_v3 = vld [vmem:[%s189_s1 + $0x8] sm:$0xff] }
   0x2   :  { %49 = vmatpush.msra.mxu0 %v27_v0  ;;  %97 = vmatpush.msra.mxu1 %v27_v0  ;;  %21 = vst.msk [vmem:[#allocation2 + $0x8] sm:$0xff] %vm19_vm0, %v132_v2 }
   0x3   :  { %8 = vsyncpa [#allocation4], 0  ;;  %v24_v4 = vld [vmem:[%s189_s1] sm:$0xff]  ;;  %v23_v6 = vld [vmem:[%s188_s0 + $0x8] sm:$0xff]  ;;  %s83_s28 = sshll.u32 %s191_s3, 4  ;;  %s134_s29 = smov 128   ;;  %s84_s28 = int_to_ptr.hbm [resolvable:$true] %s83_s28 }
   0x4   :  { %50 = vmatpush.msra.mxu0 %v26_v1  ;;  %98 = vmatpush.msra.mxu1 %v26_v1  ;;  %v22_v5 = vld [vmem:[%s188_s0] sm:$0xff]  ;;  %s133_s0 = smov [#allocation3]   ;;  %s135_s30 = smov 8  }
   0x5   :  { %v105_v13 = vld [vmem:[%s190_s2] ss:$0 sm:$0xff]  ;;  %s81_s25 = sshll.u32 %s133_s0, 4  ;;  %s82_s25 = int_to_ptr.vmem [resolvable:$true] %s81_s25 }
   0x6   :  { %51 = vmatpush.msra.mxu0 %v25_v3  ;;  %99 = vmatpush.msra.mxu1 %v25_v3 }
   0x8   :  { %52 = vmatpush.msra.mxu0 %v24_v4  ;;  %100 = vmatpush.msra.mxu1 %v24_v4  ;;  %v28_v7 = vld [vmem:[#allocation2] sm:$0xff] }
   0x9   :  { %95 = vmatmul.msk.f32.vlgmr.msra.gmra.mxu0 %vm19_vm0, %v22_v5  ;;  %96 = vmatmul.msk.f32.vlgmr.msra.gmra.mxu1 %vm19_vm0, %v23_v6  ;;  %v29_v8 = vld [vmem:[#allocation2 + $0x8] sm:$0xff] }
  0x86   :  { %v54_v9 = vpop.f32.mrf.mxu0  ;;  %v57_v10 = vpop.f32.mrf.mxu1 }
  0x87   :  { %v60_v11 = vadd.f32 %v54_v9, %v28_v7  ;;  %v61_v12 = vadd.f32 %v57_v10, %v29_v8 }
  0x89   :  { %62 = vst.msk [vmem:[#allocation2] sm:$0xff] %vm19_vm0, %v60_v11 }
  0x8a   :  { %63 = vst.msk [vmem:[#allocation2 + $0x8] sm:$0xff] %vm19_vm0, %v61_v12 }
  0x90   :  { %v67_v14 = vld [vmem:[#allocation2] sm:$0xff] }
  0x91   :  { %v68_v15 = vld [vmem:[#allocation2 + $0x8] sm:$0xff]  ;;  %v73_v16 = vadd.f32 %v105_v13, %v67_v14 }
  0x92   :  { %v74_v17 = vadd.f32 %v105_v13, %v68_v15 }
  0x93   :  { %75 = vst.msk [vmem:[#allocation3] sm:$0xff] %vm19_vm0, %v73_v16 }
  0x94   :  { %76 = vst.msk [vmem:[#allocation3 + $0x8] sm:$0xff] %vm19_vm0, %v74_v17 }
  0x95   :  { %89 = dma.vmem_to_hbm [thread:$0]  %s82_s25, 256, %s84_s28, [#allocation4], %s134_s29, %s134_s29, %s135_s30  }
  0x96   :  { %130 = dma.done.wait [#allocation4], 256  }
  0x97   :  { %131 = vsyncadd [#allocation4], 4294967040 }
  0x98   :  { %94 = vsyncpa [#allocation4], 1 }

// kernel: attention_forward.4
= control target key start
LH: loop header
LB: loop body
LE: loop exit
PB: predicated region body
PF: predicated region fallthrough
CT: control target
= control target key end

     0   :  { %11 = vsyncpa [#allocation3], 0  ;;  %s1331_s0 = inlined_call_operand.vmem [shape: f32[3,2,8,32], index: 0, kind: input, shape index: {}, may-alias: {0,1,2}]   ;;  %s1332_s1 = inlined_call_operand.vmem [shape: f32[3,2,8,32], index: 1, kind: input, shape index: {}, may-alias: {0,1,2}]   ;;  %s1333_s2 = inlined_call_operand.vmem [shape: f32[3,2,8,32], index: 2, kind: input, shape index: {}, may-alias: {0,1,2}]   ;;  %s1334_s3 = inlined_call_operand.vmem [shape: f32[2,1,8,8], index: 3, kind: input, shape index: {}]   ;;  %s1335_s4 = inlined_call_operand.vmem [shape: f32[2,8,32], index: 4, kind: output, shape index: {0}]   ;;  %s1336_s5 = inlined_call_operand.hbm [shape: f32[2,4,8,8], index: 5, kind: output, shape index: {1}]  }
   0x1   :  { %13 = vsyncpa [#allocation3 + $0x1], 0  ;;  %s1155_s18 = smov 0   ;;  %s1157_s19 = smov 0  }
   0x2   :  { %s1159_s20 = smov 0   ;;  %s1161_s21 = smov 0  }
   0x3   :  { %s1163_s22 = smov 0   ;;  %s1165_s23 = smov 0  }
   0x4 LB: > { %s926_s24 = sadd.s32 4294967295, %s1116_s23   ;;  %s927_s25 = sadd.s32 4294967294, %s1116_s23   ;;  %s1116_s23 = sphi %s1165_s23, %s19_s23   ;;  %s1112_s22 = sphi %s1163_s22, %s1343_s22   ;;  %s1108_s21 = sphi %s1161_s21, %s1342_s21   ;;  %s1104_s20 = sphi %s1159_s20, %s1341_s20   ;;  %s1100_s19 = sphi %s1157_s19, %s1340_s19   ;;  %s1096_s18 = sphi %s1155_s18, %s1339_s18  }
   0x5   : > { %s38_s26 = sadd.s32 1, %s1112_s22  ;;  %s193_s27 = sadd.s32 1, %s1104_s20 }
   0x6   : > { %p40_p0 = scmp.ge.s32.totalorder %s38_s26, 2  ;;  %p203_p1 = scmp.ne.s32.totalorder %s1104_s20, %s1100_s19 }
   0x7   : > { %p204_p2 = scmp.eq.s32.totalorder %s926_s24, 1  ;;  %p209_p3 = scmp.ne.s32.totalorder %s1100_s19, %s1096_s18 }
   0x8   : > { %s1345_s26 = smov (%p40_p0, %s38_s26), 0  ;;  %p210_p5 = scmp.eq.s32.totalorder %s927_s25, 1 }
   0x9   : > { %p1195_p4 = por %p204_p2, %p203_p1  ;;  %s186_s29 = ssub.s32 %s1112_s22, %s1345_s26 }
   0xa   : > { %p930_p6 = scmp.ge.s32.totalorder %s1116_s23, 1  ;;  %p191_p7 = scmp.eq.s32.totalorder %s186_s29, 0 }
   0xb   : > { %p1202_p8 = por %p210_p5, %p209_p3  ;;  %p273_p9 = scmp.lt.s32.totalorder %s1116_s23, 3 }
   0xc   : > { %s1208_s6 = scalar_select %p191_p7, %s1104_s20, %s193_s27  }
   0xd   : > { %p274_p10 = pnand %p930_p6, %p273_p9 }
   0xe   : > { %p339_p11 = scmp.lt.s32.totalorder (!%p274_p10), %s1108_s21, 1  ;;  %s1118_s15 = smov (!%p274_p10), 120  }
   0xf   : > { %277 = sbr.rel (%p274_p10) target bundleno = 1070 (0x42e), region = 36  ;;  %s1119_s16 = smov (!%p274_p10), 112  }
  0x10   : > { %s1120_s17 = smov (!%p274_p10), 104   ;;  %s336_s10 = sand.u32 (!%p274_p10), 1, %s1100_s19  }
  0x11   : > { %s1121_s13 = smov (!%p274_p10), 24   ;;  %s733_s29 = scalar_lea.sflag (!%p274_p10), [#allocation3], %s336_s10 }
  0x14   : > { %s340_s7 = scalar_select %p339_p11, %s1108_s21, 1  ;;  %vm387_vm0 = vcmask 64512  }
  0x16   : > { %s1212_s8 = sshll.u32 %s340_s7, 3 }
  0x17   : > { %s834_s11 = scalar_lea.vmem %s1332_s1, %s1212_s8  ;;  %s348_s14 = scalar_lea.vmem %s1331_s0, %s1212_s8 }
  0x18   : > { %v937_v0 = vld [vmem:[%s834_s11 + $0x10] sm:$0xff]  ;;  %v383_v1 = vld [vmem:[%s348_s14] sm:$0xff]  ;;  %s371_s27 = scalar_lea.vmem %s1334_s3, %s1212_s8  ;;  %s838_s9 = scalar_lea.vmem %s1333_s2, %s1212_s8 }
  0x19   : > { %939 = vmatpush.xpose.msk.msra.mxu0 %vm387_vm0, %v937_v0  ;;  %464 = vrot.lane.b32.xlu1 %v937_v0, %s1118_s15  ;;  %v1235_v4 = vld [vmem:[%s371_s27] sm:$0xff]  ;;  %s931_s11 = sshll.u32 %s336_s10, 5  ;;  %s959_s14 = sshll.u32 %s1108_s21, 5 }
  0x1a   : > { %545 = vrot.lane.b32.xlu2 %v937_v0, %s1119_s16  ;;  %v1249_v19 = vld [vmem:[%s838_s9 + $0x20] sm:$0xff]  ;;  %s1261_s12 = scalar_lea.vmem [#allocation2], %s931_s11  ;;  %s1122_s27 = smov 8  }
  0x1b   : > { %457 = vmatpush.msra.mxu1 %v1249_v19  ;;  %s751_s24 = sshll.u32 %s1261_s12, 4  ;;  %s752_s24 = int_to_ptr.vmem [resolvable:$true] %s751_s24 }
  0x1c   : > { %940 = vmatmul.msk.f32.vlgmr.msra.gmra.mxu0 %vm387_vm0, %v383_v1 }
  0x21   : > { %462 = vrot.lane.b32.xlu1 %v383_v1, %s1118_s15 }
  0x22   : > { %625 = vrot.lane.b32.xlu2 %v937_v0, %s1120_s17 }
  0x29   : > { %623 = vrot.lane.b32.xlu1 %v383_v1, %s1120_s17 }
  0x74   : > { %v546_v8 = vpop.permute.xlu2 %545 }
  0x75   : > { %946 = vmatpush.xpose.msk.msrb.mxu1 %vm387_vm0, %v546_v8 }
  0x7c   : > { %v626_v9 = vpop.permute.xlu2 %625 }
  0x7d   : > { %950 = vmatpush.xpose.msk.msrb.mxu0 %vm387_vm0, %v626_v9 }
  0x8b   : > { %v465_v2 = vpop.permute.xlu1 %464 }
  0x8c   : > { %942 = vmatpush.xpose.msk.msra.mxu2 %vm387_vm0, %v465_v2 }
  0x93   : > { %v463_v3 = vpop.permute.xlu1 %462 }
  0x94   : > { %943 = vmatmul.msk.f32.vlgmr.msra.gmra.mxu2 %vm387_vm0, %v463_v3 }
  0x99   : > { %v411_v5 = vpop.f32.mrf.mxu0 }
  0x9a   : > { %v412_v6 = vadd.f32 %v411_v5, %v1235_v4 }
  0x9b   : > { %v624_v10 = vpop.permute.xlu1 %623 }
  0x9c   : > { %v414_v7 = vsel %vm387_vm0, %v412_v6, -inf  ;;  %951 = vmatmul.msk.f32.vlgmr.msrb.gmra.mxu0 %vm387_vm0, %v624_v10 }
  0x9d   : > { %415 = vmax.xlane.f32.xlu0 %v414_v7 }
 0x110   : > { %v416_v11 = vpop.xlane.xlu0 %415 }
 0x111   : > { %v417_v12 = vsub.f32 %v412_v6, %v416_v11 }
 0x113   : > { %v418_v13 = vmul.f32 1.442695, %v417_v12 }
 0x115   : > { %1022 = vpow2.f32 %v418_v13 }
 0x117   : > { %v487_v14 = vpop.f32.mrf.mxu2 }
 0x118   : > { %v488_v15 = vadd.f32 %v487_v14, %v1235_v4 }
 0x119   : > { %v648_v20 = vpop.f32.mrf.mxu0 }
 0x11a   : > { %v490_v16 = vsel %vm387_vm0, %v488_v15, -inf  ;;  %v649_v21 = vadd.f32 %v648_v20, %v1235_v4 }
 0x11b   : > { %v1023_v17 = vpop.eup %1022  ;;  %491 = vmax.xlane.f32.xlu2 %v490_v16 }
 0x11c   : > { %v420_v18 = vsel %vm387_vm0, %v1023_v17, 0.0  ;;  %v651_v22 = vsel %vm387_vm0, %v649_v21, -inf }
 0x11d   : > { %421 = vadd.xlane.f32.xlu0 %v420_v18 }
 0x131   : > { %543 = vrot.lane.b32.xlu0 %v383_v1, %s1119_s16 }
 0x15b   : > { %652 = vmax.xlane.f32.xlu0 %v651_v22 }
 0x16f   : > { %677 = vrot.lane.b32.xlu0 %v1249_v19, %s1120_s17  ;;  %s750_s17 = scalar_lea.hbm %s1336_s5, %s959_s14 }
 0x170   : > { %s753_s25 = sshll.u32 %s750_s17, 4  ;;  %s754_s25 = int_to_ptr.hbm [resolvable:$true] %s753_s25 }
 0x171   : > { %s1052_s7 = sshra.s32 %s754_s25, 4  ;;  %s1053_s7 = int_to_ptr.hbm [resolvable:$true] %s1052_s7 }
 0x172   : > { %s1054_s9 = scalar_lea.hbm %s1053_s7, 32  ;;  %p1059_p1 = scmp.lt.s32.totalorder %s1053_s7, %s1336_s5 }
 0x173   : > { %p1055_p12 = scmp.ne.s32.totalorder %s1053_s7, %s1054_s9 }
 0x175   : > { %p1056_p13 = pnand %p1055_p12, %p1195_p4 }
 0x177   : > { %p1057_p0 = pneg %p1056_p13 }
 0x18e   : > { %v492_v23 = vpop.xlane.xlu2 %491 }
 0x18f   : > { %v493_v24 = vsub.f32 %v488_v15, %v492_v23 }
 0x190   : > { %v422_v25 = vpop.xlane.xlu0 %421 }
 0x191   : > { %1024 = vrcp.f32 %v422_v25  ;;  %v494_v26 = vmul.f32 1.442695, %v493_v24  ;;  %v434_v32 = vand.u32 2147483648, %v422_v25  ;;  %v432_v34 = vand.u32 2147483647, %v422_v25 }
 0x192   : > { %vm428_vm2 = vweird.f32 %v422_v25 }
 0x193   : > { %1026 = vpow2.f32 %v494_v26  ;;  %v435_v36 = vor.u32 1.1754944e-38, %v434_v32  ;;  %vm433_vm4 = vcmp.eq.f32.partialorder %v432_v34, 8.507059e+37 }
 0x197   : > { %v1025_v27 = vpop.eup %1024 }
 0x198   : > { %v424_v28 = vmul.f32 %v1025_v27, %v422_v25  ;;  %vm429_vm1 = vweird.f32 %v1025_v27 }
 0x199   : > { %v1027_v29 = vpop.eup %1026  ;;  %vm430_vm3 = vmor %vm428_vm2, %vm429_vm1 }
 0x19a   : > { %v425_v30 = vsub.f32 1.0, %v424_v28  ;;  %v496_v31 = vsel %vm387_vm0, %v1027_v29, 0.0 }
 0x19b   : > { %497 = vadd.xlane.f32.xlu2 %v496_v31 }
 0x19c   : > { %v426_v33 = vmul.f32 %v1025_v27, %v425_v30 }
 0x19e   : > { %v427_v35 = vadd.f32 %v1025_v27, %v426_v33 }
 0x1a0   : > { %v431_v37 = vsel %vm430_vm3, %v1025_v27, %v427_v35 }
 0x1a1   : > { %v436_v38 = vsel %vm433_vm4, %v435_v36, %v431_v37 }
 0x1a2   : > { %v437_v39 = vmul.f32 %v1023_v17, %v436_v38 }
 0x1a3   : > { %v544_v40 = vpop.permute.xlu0 %543 }
 0x1a4   : > { %438 = vst.msk [vmem:[%s1261_s12] sm:$0xff] %vm387_vm0, %v437_v39  ;;  %941 = vmatmul.msk.f32.vlgmr.msra.gmra.mxu1 %vm387_vm0, %v437_v39 }
 0x1ac   : > { %947 = vmatmul.msk.f32.vlgmr.msrb.gmra.mxu1 %vm387_vm0, %v544_v40 }
 0x1ce   : > { %v653_v52 = vpop.xlane.xlu0 %652 }
 0x1cf   : > { %v654_v55 = vsub.f32 %v649_v21, %v653_v52 }
 0x1d1   : > { %v655_v56 = vmul.f32 1.442695, %v654_v55 }
 0x1e1   : > { %v678_v62 = vpop.permute.xlu0 %677 }
 0x1e2   : > { %698 = vmatpush.msrb.mxu2 %v678_v62 }
 0x20e   : > { %v498_v41 = vpop.xlane.xlu2 %497 }
 0x20f   : > { %1028 = vrcp.f32 %v498_v41  ;;  %v510_v44 = vand.u32 2147483648, %v498_v41  ;;  %vm504_vm5 = vweird.f32 %v498_v41  ;;  %v508_v46 = vand.u32 2147483647, %v498_v41 }
 0x210   : > { %1030 = vpow2.f32 %v655_v56 }
 0x211   : > { %v511_v48 = vor.u32 1.1754944e-38, %v510_v44  ;;  %vm509_vm8 = vcmp.eq.f32.partialorder %v508_v46, 8.507059e+37 }
 0x215   : > { %v1029_v42 = vpop.eup %1028 }
 0x216   : > { %v500_v43 = vmul.f32 %v1029_v42, %v498_v41  ;;  %vm505_vm6 = vweird.f32 %v1029_v42  ;;  %v1031_v60 = vpop.eup %1030 }
 0x217   : > { %vm506_vm7 = vmor %vm504_vm5, %vm505_vm6  ;;  %v657_v61 = vsel %vm387_vm0, %v1031_v60, 0.0 }
 0x218   : > { %v501_v45 = vsub.f32 1.0, %v500_v43 }
 0x21a   : > { %v502_v47 = vmul.f32 %v1029_v42, %v501_v45 }
 0x21c   : > { %v503_v49 = vadd.f32 %v1029_v42, %v502_v47 }
 0x21e   : > { %v507_v50 = vsel %vm506_vm7, %v1029_v42, %v503_v49 }
 0x21f   : > { %v512_v51 = vsel %vm509_vm8, %v511_v48, %v507_v50 }
 0x220   : > { %v513_v53 = vmul.f32 %v1027_v29, %v512_v51 }
 0x221   : > { %v1267_v54 = vpop.f32.mrf.mxu1 }
 0x222   : > { %944 = vst.msk [vmem:[%s1261_s12 + $0x8] sm:$0xff] %vm387_vm0, %v513_v53 }
 0x229   : > { %v568_v57 = vpop.f32.mrf.mxu1 }
 0x22a   : > { %v569_v58 = vadd.f32 %v568_v57, %v1235_v4 }
 0x22c   : > { %v571_v59 = vsel %vm387_vm0, %v569_v58, -inf }
 0x22d   : > { %572 = vmax.xlane.f32.xlu1 %v571_v59 }
 0x235   : > { %658 = vadd.xlane.f32.xlu1 %v657_v61 }
 0x24e   : > { %597 = vrot.lane.b32.xlu1 %v1249_v19, %s1119_s16 }
 0x2a0   : > { %v573_v63 = vpop.xlane.xlu1 %572 }
 0x2a1   : > { %v574_v0 = vsub.f32 %v569_v58, %v573_v63 }
 0x2a3   : > { %v575_v1 = vmul.f32 1.442695, %v574_v0 }
 0x2a5   : > { %1032 = vpow2.f32 %v575_v1 }
 0x2a8   : > { %v659_v2 = vpop.xlane.xlu1 %658 }
 0x2a9   : > { %1034 = vrcp.f32 %v659_v2  ;;  %v671_v8 = vand.u32 2147483648, %v659_v2  ;;  %v669_v10 = vand.u32 2147483647, %v659_v2  ;;  %vm665_vm10 = vweird.f32 %v659_v2 }
 0x2ab   : > { %v1033_v3 = vpop.eup %1032  ;;  %v672_v12 = vor.u32 1.1754944e-38, %v671_v8  ;;  %vm670_vm12 = vcmp.eq.f32.partialorder %v669_v10, 8.507059e+37 }
 0x2ac   : > { %v577_v4 = vsel %vm387_vm0, %v1033_v3, 0.0 }
 0x2ad   : > { %578 = vadd.xlane.f32.xlu2 %v577_v4 }
 0x2af   : > { %v1035_v5 = vpop.eup %1034 }
 0x2b0   : > { %v661_v6 = vmul.f32 %v1035_v5, %v659_v2  ;;  %vm666_vm9 = vweird.f32 %v1035_v5 }
 0x2b1   : > { %vm667_vm11 = vmor %vm665_vm10, %vm666_vm9 }
 0x2b2   : > { %v662_v7 = vsub.f32 1.0, %v661_v6 }
 0x2b4   : > { %v663_v9 = vmul.f32 %v1035_v5, %v662_v7 }
 0x2b6   : > { %v664_v11 = vadd.f32 %v1035_v5, %v663_v9 }
 0x2b8   : > { %v668_v13 = vsel %vm667_vm11, %v1035_v5, %v664_v11 }
 0x2b9   : > { %v673_v14 = vsel %vm670_vm12, %v672_v12, %v668_v13 }
 0x2ba   : > { %v674_v15 = vmul.f32 %v1031_v60, %v673_v14 }
 0x2bc   : > { %952 = vst.msk [vmem:[%s1261_s12 + $0x18] sm:$0xff] %vm387_vm0, %v674_v15  ;;  %953 = vmatmul.msk.f32.vlgmr.msrb.gmra.mxu2 %vm387_vm0, %v674_v15 }
 0x2c0   : > { %v598_v21 = vpop.permute.xlu1 %597 }
 0x2c5   : > { %517 = vrot.lane.b32.xlu2 %v1249_v19, %s1118_s15 }
 0x320   : > { %v579_v16 = vpop.xlane.xlu2 %578 }
 0x321   : > { %1036 = vrcp.f32 %v579_v16  ;;  %v591_v23 = vand.u32 2147483648, %v579_v16  ;;  %v589_v25 = vand.u32 2147483647, %v579_v16  ;;  %vm585_vm14 = vweird.f32 %v579_v16 }
 0x323   : > { %v592_v19 = vor.u32 1.1754944e-38, %v591_v23  ;;  %vm590_vm1 = vcmp.eq.f32.partialorder %v589_v25, 8.507059e+37 }
 0x327   : > { %v1037_v17 = vpop.eup %1036 }
 0x328   : > { %v581_v18 = vmul.f32 %v1037_v17, %v579_v16  ;;  %v518_v20 = vpop.permute.xlu2 %517  ;;  %vm586_vm13 = vweird.f32 %v1037_v17 }
 0x329   : > { %538 = vmatpush.msra.mxu3 %v518_v20  ;;  %vm587_vm15 = vmor %vm585_vm14, %vm586_vm13 }
 0x32a   : > { %v582_v22 = vsub.f32 1.0, %v581_v18  ;;  %945 = vmatmul.msk.f32.vlgmr.msra.gmra.mxu3 %vm387_vm0, %v513_v53 }
 0x32b   : > { %618 = vmatpush.msrb.mxu3 %v598_v21 }
 0x32c   : > { %v583_v24 = vmul.f32 %v1037_v17, %v582_v22 }
 0x32e   : > { %v584_v26 = vadd.f32 %v1037_v17, %v583_v24 }
 0x330   : > { %v588_v27 = vsel %vm587_vm15, %v1037_v17, %v584_v26 }
 0x331   : > { %v593_v28 = vsel %vm590_vm1, %v592_v19, %v588_v27 }
 0x332   : > { %v594_v29 = vmul.f32 %v1033_v3, %v593_v28 }
 0x334   : > { %948 = vst.msk [vmem:[%s1261_s12 + $0x10] sm:$0xff] %vm387_vm0, %v594_v29  ;;  %949 = vmatmul.msk.f32.vlgmr.msrb.gmra.mxu3 %vm387_vm0, %v594_v29 }
 0x33f   : > { %v700_v30 = vpop.f32.mrf.mxu2 }
 0x340   : > { %712 = vrot.lane.b32.xlu1 %v700_v30, %s1121_s13  ;;  %s1058_s13 = scalar_lea.hbm %s1336_s5, 64 }
 0x341   : > { %p1060_p2 = scmp.lt.s32.totalorder %s1058_s13, %s1054_s9 }
 0x343   : > { %p1061_p3 = por %p1060_p2, %p1059_p1 }
 0x345   : > { %p1062_p5 = pnand %p1061_p3, %p1057_p0 }
 0x3ad   : > { %v540_v31 = vpop.f32.mrf.mxu3 }
 0x3ae   : > { %704 = vrot.lane.b32.xlu2 %v540_v31, %s1122_s27 }
 0x3af   : > { %1065 = shalt.err (!%p1062_p5)
}
 0x3b0   : > { %s1123_s10 = smov 128   ;;  %s1124_s15 = smov 16   ;;  %vm716_vm2 = vcmask 130048   ;;  %vm718_vm3 = vcmask 195584   ;;  %vm720_vm4 = vcmask 261120  }
 0x3b1   : > { %960 = dma.vmem_to_hbm [thread:$0]  (%p1195_p4), %s752_s24, 512, %s754_s25, %s733_s29, %s1123_s10, %s1123_s10, %s1122_s27  }
 0x3b2   : > { %s381_s7 = scalar_lea.vmem %s1335_s4, %s1212_s8  ;;  %v713_v36 = vpop.permute.xlu1 %712 }
 0x3b7   : > { %v620_v32 = vpop.f32.mrf.mxu3 }
 0x3b8   : > { %708 = vrot.lane.b32.xlu0 %v620_v32, %s1124_s15 }
 0x408   : > { %v705_v33 = vpop.permute.xlu2 %704 }
 0x409   : > { %v715_v34 = vsel %vm387_vm0, %v1267_v54, %v705_v33 }
 0x42a   : > { %v709_v35 = vpop.permute.xlu0 %708 }
 0x42b   : > { %v717_v37 = vsel %vm716_vm2, %v715_v34, %v709_v35 }
 0x42c   : > { %v719_v38 = vsel %vm718_vm3, %v717_v37, %v713_v36 }
 0x42d   : > { %721 = vst.msk [vmem:[%s381_s7] sm:$0xff] %vm720_vm4, %v719_v38 }
 0x42e PF: > { %p966_p4 = scmp.ge.s32.totalorder %s1116_s23, 2  ;;  %s781_s28 = sand.u32 1, %s1096_s18  }
 0x42f   : > { %s782_s24 = scalar_lea.sflag [#allocation3], %s781_s28 }
 0x430   : > { %p963_p6 = pnand %p966_p4, %p1202_p8 }
 0x432   : > { %p964_p7 = pneg %p963_p6 }
 0x434   : > { %1091 = dma.done.wait (%p964_p7), %s782_s24, 512  }
 0x435   : > { %1093 = vsyncadd (%p964_p7), %s782_s24, 4294966784  ;;  %s19_s23 = sadd.s32 1, %s1116_s23   ;;  %s1339_s18 = smov %s1100_s19 }
 0x436   : > { %p16_p9 = scmp.ge.s32.totalorder %s19_s23, 4   ;;  %s1340_s19 = smov %s1104_s20 }
 0x437   : > { %s1341_s20 = smov %s1208_s6  ;;  %s1342_s21 = smov %s1112_s22 }
 0x438   : > { %s1343_s22 = smov %s1345_s26  ;;  %18 = sbr.rel (!%p16_p9) target bundleno = 4 (0x4), region = 95 }
 0x43d   :  { %788 = vsyncpa [#allocation3], 1 }
 0x43e   :  { %790 = vsyncpa [#allocation3 + $0x1], 1 }

</bundles_post_ra>
